<compile_context>
chip_gen: v7x
topology: tpu7x:2x2x1
jax: 0.10.0
libtpu: 0.0.40
codegen_flags: <defaults>
</compile_context>

<pallas_src>
import jax
import jax.numpy as jnp
from jax import lax
from jax.experimental import pallas as pl
from jax.experimental.pallas import tpu as pltpu

ALPHA = 0.1  # LeakyReLU negative slope (alpha in the torch module)


def _round_up(x, m):
    return ((x + m - 1) // m) * m


def _gat_pair_kernel(x_ref, w_ref, a_ref, adj_ref, out_ref):
    """Grid point g=0: layer(x0, A).  Grid point g=1: layer(x1, A^T)."""
    g = pl.program_id(0)

    x = x_ref[0]                                   # (N, Fin)  f32
    w = w_ref[...]                                 # (Fin, Fp) f32

    # h = x @ W : bf16 MXU operands, f32 accumulation.
    h = jnp.dot(x.astype(jnp.bfloat16), w.astype(jnp.bfloat16),
                preferred_element_type=jnp.float32)            # (N, Fp) f32
    h_bf = h.astype(jnp.bfloat16)

    a = a_ref[...]                                 # (2, Fp): row0 = a1, row1 = a2
    # f1_i = a1 . h_i  -> VPU multiply + lane reduction (no 1-wide MXU matmul).
    f1 = jnp.sum(h * a[0:1, :], axis=1, keepdims=True)          # (N, 1)
    # f2_j = a2 . h_j laid out along lanes -> (1, N) via a thin bf16 matvec.
    f2t = lax.dot_general(a[1:2, :].astype(jnp.bfloat16), h_bf,
                          (((1,), (1,)), ((), ())),
                          preferred_element_type=jnp.float32)   # (1, N)

    # e_ij = exp(-leakyrelu(f1_i + f2_j)) masked by adjacency.
    logits = f1 + f2t                                            # (N, N)
    lrelu = jnp.where(logits > 0, logits, ALPHA * logits)
    e = jnp.exp(-lrelu)

    # Branch 0 uses A, branch 1 uses A^T (in-kernel transpose; A^T never in HBM).
    adj = adj_ref[...]
    gf = g.astype(jnp.float32)                                   # 0.0 or 1.0
    adj_g = adj * (1.0 - gf) + adj.T * gf
    e = e * adj_g                                                # 0/1 float mask

    # h'_i = (sum_j e_ij h_j) / (sum_j e_ij)
    rowsum = jnp.sum(e, axis=1, keepdims=True)                   # (N, 1)
    h_prime = jnp.dot(e.astype(jnp.bfloat16), h_bf,
                      preferred_element_type=jnp.float32)        # (N, Fp)
    inv = pl.reciprocal(rowsum, approx=True)                     # EUP slot
    out_ref[0] = jnp.tanh(h_prime * inv)                         # tanh activation


def gat_layer_pair(x_stacked, adj, W_pad, a_pad):
    """One GraphAttentionLayer applied to (A, A^T) in a single 2-wide-grid call.

    x_stacked: (1, N, Fin) if both branches share the input (layer 0), else (2, N, Fin).
    Returns (2, N, Fout_pad) f32: slab 0 = layer(x0, A), slab 1 = layer(x1, A^T).
    """
    Sx, N, Fin = x_stacked.shape
    Fin_w, Fpad = W_pad.shape
    assert Fin_w == Fin

    if Sx == 2:
        x_map = lambda g: (g, 0, 0)
    else:
        x_map = lambda g: (0, 0, 0)     # shared input: same block for both branches

    return pl.pallas_call(
        _gat_pair_kernel,
        out_shape=jax.ShapeDtypeStruct((2, N, Fpad), jnp.float32),
        grid=(2,),
        in_specs=[
            pl.BlockSpec((1, N, Fin), x_map),           # x (per-branch or shared)
            pl.BlockSpec((Fin, Fpad), lambda g: (0, 0)),  # W (shared, lane-dense)
            pl.BlockSpec((2, Fpad), lambda g: (0, 0)),    # [a1; a2] rows
            pl.BlockSpec((N, N), lambda g: (0, 0)),       # adjacency (A only)
        ],
        out_specs=pl.BlockSpec((1, N, Fpad), lambda g: (g, 0, 0)),
        compiler_params=pltpu.CompilerParams(
            dimension_semantics=("parallel",)),           # 2 TCs on v7x
    )(x_stacked, W_pad, a_pad, adj)


def init_gat_params(key, dims):
    """Xavier-normal-ish init (gain=1.414) per GAT layer, padded to lane-dense widths."""
    params = []
    fin = dims[0]                     # running (padded) input width for the kernel
    for i in range(len(dims) - 1):
        fin_true, fout = dims[i], dims[i + 1]
        key, k1, k2 = jax.random.split(key, 3)
        gain = 1.414
        std_w = gain * (2.0 / (fin_true + fout)) ** 0.5
        W = std_w * jax.random.normal(k1, (fin_true, fout), jnp.float32)
        std_a = gain * (2.0 / (1 + 2 * fout)) ** 0.5
        a = std_a * jax.random.normal(k2, (1, 2 * fout), jnp.float32)
        a1 = a[:, :fout]              # applied to h_i (rows)
        a2 = a[:, fout:]              # applied to h_j (cols)

        fout_pad = _round_up(fout, 128)
        W_pad = jnp.zeros((fin, fout_pad), jnp.float32).at[:fin_true, :fout].set(W)
        a_pad = (jnp.zeros((2, fout_pad), jnp.float32)
                 .at[0, :fout].set(a1[0])
                 .at[1, :fout].set(a2[0]))
        params.append((W_pad, a_pad, fout))
        fin = fout_pad                # next layer consumes the padded output slab
    return params


def gat_forward_direct(A_hat, emb_input, params):
    """GAT.forward (net='s', direct=True): [x, cat(l1(A),l1(A^T)), cat(l2(A),l2(A^T))]."""
    outputs = [emb_input]
    x_stacked = emb_input[None]       # (1, N, Fin): layer-0 input shared by both branches
    for (W_pad, a_pad, fout) in params:
        out = gat_layer_pair(x_stacked, A_hat, W_pad, a_pad)   # (2, N, Fout_pad)
        outputs.append(jnp.concatenate([out[0, :, :fout], out[1, :, :fout]], axis=1))
        x_stacked = out               # padded (extra cols are exactly 0) -> next layer
    return outputs


if __name__ == "__main__":
    key = jax.random.PRNGKey(0)
    k_feat, k_adj, k_param = jax.random.split(key, 3)

    # Small shapes consistent with the module:
    #   source_feats: (num_source_nodes, input_dim); dims = [input_dim, 200, output_dim]
    N = 128            # num_source_nodes
    input_dim = 64
    output_dim = 32
    num_GCN_blocks = 2  # matches len(dims) - 1

    source_feats = jax.random.normal(k_feat, (N, input_dim), jnp.float32)

    # Dense (possibly asymmetric) adjacency with self-loops so every row has mass.
    adj_rand = (jax.random.uniform(k_adj, (N, N)) < 0.1).astype(jnp.float32)
    A_hat = jnp.clip(adj_rand + jnp.eye(N, dtype=jnp.float32), 0.0, 1.0)

    dims = [input_dim, 200, output_dim]
    params = init_gat_params(k_param, dims)
    assert len(params) == num_GCN_blocks

    outputs = gat_forward_direct(A_hat, source_feats, params)
    outputs = [jax.block_until_ready(o) for o in outputs]

    # Shape checks mirroring forward_direct's concatenation along dim=1.
    assert outputs[0].shape == (N, input_dim)
    assert outputs[1].shape == (N, 2 * 200)
    assert outputs[2].shape == (N, 2 * output_dim)
    assert all(bool(jnp.all(jnp.isfinite(o))) for o in outputs)

    print("KERNEL_OK")
</pallas_src>

<mosaic_0001>
module attributes {stable_mosaic.version = 11 : i64} {
  func.func @_gat_pair_kernel(%arg0: i32, %arg1: memref<1x128x64xf32, #tpu.memory_space<vmem>>, %arg2: memref<64x256xf32, #tpu.memory_space<vmem>>, %arg3: memref<2x256xf32, #tpu.memory_space<vmem>>, %arg4: memref<128x128xf32, #tpu.memory_space<vmem>>, %arg5: memref<1x128x256xf32, #tpu.memory_space<vmem>>) attributes {dimension_semantics = [#tpu.dimension_semantics<parallel>], iteration_bounds = array<i64: 2>, scalar_prefetch = 0 : i64, scratch_operands = 0 : i64, tpu.core_type = #tpu.core_type<tc>, window_params = [{pipeline_mode = #tpu.pipeline_mode<synchronous>, transform_indices = @transform_0, window_bounds = array<i64: 1, 128, 64>}, {pipeline_mode = #tpu.pipeline_mode<synchronous>, transform_indices = @transform_1, window_bounds = array<i64: 64, 256>}, {pipeline_mode = #tpu.pipeline_mode<synchronous>, transform_indices = @transform_2, window_bounds = array<i64: 2, 256>}, {pipeline_mode = #tpu.pipeline_mode<synchronous>, transform_indices = @transform_3, window_bounds = array<i64: 128, 128>}, {transform_indices = @transform_4, window_bounds = array<i64: 1, 128, 256>}]} {
    %c0 = arith.constant 0 : index
    %c0_0 = arith.constant 0 : index
    %c0_1 = arith.constant 0 : index
    %0 = vector.load %arg1[%c0, %c0_0, %c0_1] : memref<1x128x64xf32, #tpu.memory_space<vmem>>, vector<1x128x64xf32>
    %1 = vector.shape_cast %0 : vector<1x128x64xf32> to vector<128x64xf32>
    %c0_2 = arith.constant 0 : index
    %c0_3 = arith.constant 0 : index
    %2 = vector.load %arg2[%c0_2, %c0_3] : memref<64x256xf32, #tpu.memory_space<vmem>>, vector<64x256xf32>
    %3 = arith.truncf %1 : vector<128x64xf32> to vector<128x64xbf16>
    %4 = arith.truncf %2 : vector<64x256xf32> to vector<64x256xbf16>
    %cst = arith.constant dense<0.000000e+00> : vector<128x256xf32>
    %5 = tpu.matmul %3, %4, %cst {dimension_numbers = #tpu.dot_dimension_numbers<[1], [0], [0], [1], [0, 0, 1, 1], [], []>} : vector<128x64xbf16>, vector<64x256xbf16>, vector<128x256xf32> -> vector<128x256xf32>
    %6 = arith.truncf %5 : vector<128x256xf32> to vector<128x256xbf16>
    %c0_4 = arith.constant 0 : index
    %c0_5 = arith.constant 0 : index
    %7 = vector.load %arg3[%c0_4, %c0_5] : memref<2x256xf32, #tpu.memory_space<vmem>>, vector<2x256xf32>
    %8 = vector.extract_strided_slice %7 {offsets = [0, 0], sizes = [1, 256], strides = [1, 1]} : vector<2x256xf32> to vector<1x256xf32>
    %9 = vector.broadcast %8 : vector<1x256xf32> to vector<128x256xf32>
    %10 = arith.mulf %5, %9 : vector<128x256xf32>
    %cst_6 = arith.constant dense<0.000000e+00> : vector<128xf32>
    %11 = vector.multi_reduction <add>, %10, %cst_6 [1] : vector<128x256xf32> to vector<128xf32>
    %12 = vector.shape_cast %11 : vector<128xf32> to vector<128x1xf32>
    %13 = vector.extract_strided_slice %7 {offsets = [1, 0], sizes = [1, 256], strides = [1, 1]} : vector<2x256xf32> to vector<1x256xf32>
    %14 = arith.truncf %13 : vector<1x256xf32> to vector<1x256xbf16>
    %cst_7 = arith.constant dense<0.000000e+00> : vector<1x128xf32>
    %15 = tpu.matmul %14, %6, %cst_7 {dimension_numbers = #tpu.dot_dimension_numbers<[1], [1], [0], [0], [0, 0, 1, 0], [], []>} : vector<1x256xbf16>, vector<128x256xbf16>, vector<1x128xf32> -> vector<1x128xf32>
    %16 = vector.broadcast %12 : vector<128x1xf32> to vector<128x128xf32>
    %17 = vector.broadcast %15 : vector<1x128xf32> to vector<128x128xf32>
    %18 = arith.addf %16, %17 : vector<128x128xf32>
    %cst_8 = arith.constant 0.000000e+00 : f32
    %19 = vector.broadcast %cst_8 : f32 to vector<128x128xf32>
    %20 = arith.cmpf ogt, %18, %19 : vector<128x128xf32>
    %cst_9 = arith.constant 1.000000e-01 : f32
    %21 = vector.broadcast %cst_9 : f32 to vector<128x128xf32>
    %22 = arith.mulf %21, %18 : vector<128x128xf32>
    %23 = arith.select %20, %18, %22 : vector<128x128xi1>, vector<128x128xf32>
    %cst_10 = arith.constant 0.000000e+00 : f32
    %24 = vector.broadcast %cst_10 : f32 to vector<128x128xf32>
    %25 = arith.subf %24, %23 : vector<128x128xf32>
    %26 = math.exp %25 : vector<128x128xf32>
    %c0_11 = arith.constant 0 : index
    %c0_12 = arith.constant 0 : index
    %27 = vector.load %arg4[%c0_11, %c0_12] : memref<128x128xf32, #tpu.memory_space<vmem>>, vector<128x128xf32>
    %28 = arith.sitofp %arg0 : i32 to f32
    %cst_13 = arith.constant 1.000000e+00 : f32
    %29 = arith.subf %cst_13, %28 : f32
    %30 = vector.broadcast %29 : f32 to vector<128x128xf32>
    %31 = arith.mulf %27, %30 : vector<128x128xf32>
    %32 = tpu.transpose %27, [1, 0] : vector<128x128xf32> -> vector<128x128xf32>
    %33 = vector.broadcast %28 : f32 to vector<128x128xf32>
    %34 = arith.mulf %32, %33 : vector<128x128xf32>
    %35 = arith.addf %31, %34 : vector<128x128xf32>
    %36 = arith.mulf %26, %35 : vector<128x128xf32>
    %cst_14 = arith.constant dense<0.000000e+00> : vector<128xf32>
    %37 = vector.multi_reduction <add>, %36, %cst_14 [1] : vector<128x128xf32> to vector<128xf32>
    %38 = vector.shape_cast %37 : vector<128xf32> to vector<128x1xf32>
    %39 = arith.truncf %36 : vector<128x128xf32> to vector<128x128xbf16>
    %cst_15 = arith.constant dense<0.000000e+00> : vector<128x256xf32>
    %40 = tpu.matmul %39, %6, %cst_15 {dimension_numbers = #tpu.dot_dimension_numbers<[1], [0], [0], [1], [0, 0, 1, 1], [], []>} : vector<128x128xbf16>, vector<128x256xbf16>, vector<128x256xf32> -> vector<128x256xf32>
    %41 = tpu.reciprocal %38 {approx = true} : vector<128x1xf32> -> vector<128x1xf32>
    %42 = vector.broadcast %41 : vector<128x1xf32> to vector<128x256xf32>
    %43 = arith.mulf %40, %42 : vector<128x256xf32>
    %44 = math.tanh %43 : vector<128x256xf32>
    %c0_16 = arith.constant 0 : index
    %c0_17 = arith.constant 0 : index
    %c0_18 = arith.constant 0 : index
    %45 = vector.load %arg5[%c0_16, %c0_17, %c0_18] : memref<1x128x256xf32, #tpu.memory_space<vmem>>, vector<1x128x256xf32>
    %46 = vector.shape_cast %45 : vector<1x128x256xf32> to vector<128x256xf32>
    %47 = vector.shape_cast %44 : vector<128x256xf32> to vector<1x128x256xf32>
    tpu.vector_store %arg5[%c0_16, %c0_17, %c0_18], %47 {strides = array<i32>} : memref<1x128x256xf32, #tpu.memory_space<vmem>>, vector<1x128x256xf32>,
    return
  }
  func.func @transform_0(%arg0: i32) -> (i32, i32, i32) {
    %c0_i32 = arith.constant 0 : i32
    %c0_i32_0 = arith.constant 0 : i32
    %c0_i32_1 = arith.constant 0 : i32
    %c0_i32_2 = arith.constant 0 : i32
    return %c0_i32, %c0_i32_0, %c0_i32_1 : i32, i32, i32
  }
  func.func @transform_1(%arg0: i32) -> (i32, i32) {
    %c0_i32 = arith.constant 0 : i32
    %c0_i32_0 = arith.constant 0 : i32
    %c0_i32_1 = arith.constant 0 : i32
    return %c0_i32, %c0_i32_0 : i32, i32
  }
  func.func @transform_2(%arg0: i32) -> (i32, i32) {
    %c0_i32 = arith.constant 0 : i32
    %c0_i32_0 = arith.constant 0 : i32
    %c0_i32_1 = arith.constant 0 : i32
    return %c0_i32, %c0_i32_0 : i32, i32
  }
  func.func @transform_3(%arg0: i32) -> (i32, i32) {
    %c0_i32 = arith.constant 0 : i32
    %c0_i32_0 = arith.constant 0 : i32
    %c0_i32_1 = arith.constant 0 : i32
    return %c0_i32, %c0_i32_0 : i32, i32
  }
  func.func @transform_4(%arg0: i32) -> (i32, i32, i32) {
    %c0_i32 = arith.constant 0 : i32
    %c0_i32_0 = arith.constant 0 : i32
    %c0_i32_1 = arith.constant 0 : i32
    return %arg0, %c0_i32, %c0_i32_0 : i32, i32, i32
  }
}

</mosaic_0001>

<bundles_post_ra>
// kernel: tpu_custom_call.1
= control target key start
LH: loop header
LB: loop body
LE: loop exit
PB: predicated region body
PF: predicated region fallthrough
CT: control target
= control target key end

     0   :  { %9 = vsyncpa [#allocation3], 0  ;;  %s1957_s0 = inlined_call_operand.vmem [shape: f32[1,128,64], index: 0, kind: input, shape index: {}]   ;;  %s1958_s1 = inlined_call_operand.vmem [shape: f32[64,256], index: 1, kind: input, shape index: {}]   ;;  %s1959_s2 = inlined_call_operand.vmem [shape: f32[2,256], index: 2, kind: input, shape index: {}]   ;;  %s1960_s3 = inlined_call_operand.hbm [shape: f32[128,128], index: 3, kind: input, shape index: {}]   ;;  %s1961_s4 = inlined_call_operand.hbm [shape: f32[2,128,256], index: 4, kind: output, shape index: {}]  }
   0x1   :  { %10 = vsyncpa [#allocation4], 0 }
   0x2   :  { %12 = vsyncpa [#allocation4 + $0x1], 0  ;;  %s1458_s15 = smov 0   ;;  %s1460_s16 = smov 0  }
   0x3   :  { %s1462_s17 = smov 0   ;;  %s1464_s18 = smov 0  }
   0x4 LB: > { %s1479_s19 = sadd.s32 4294967295, %s1424_s18   ;;  %s1127_s20 = sadd.s32 4294967294, %s1424_s18   ;;  %s1424_s18 = sphi %s1464_s18, %s1977_s18   ;;  %s1420_s17 = sphi %s1462_s17, %s1976_s17   ;;  %s1416_s16 = sphi %s1460_s16, %s1975_s16   ;;  %s1412_s15 = sphi %s1458_s15, %s1974_s15  }
   0x5   : > { %s1483_s21 = sadd.s32 1, %s1424_s18   ;;  %s109_s22 = sadd.s32 1, %s1420_s17 }
   0x6   : > { %s106_s23 = ssub.s32 %s1424_s18, %s1483_s21  ;;  %p119_p0 = scmp.ne.s32.totalorder %s1420_s17, %s1416_s16 }
   0x7   : > { %p107_p1 = scmp.eq.s32.totalorder %s106_s23, 0  ;;  %p120_p2 = scmp.eq.s32.totalorder %s1479_s19, 1 }
   0x8   : > { %p125_p3 = scmp.ne.s32.totalorder %s1416_s16, %s1412_s15  ;;  %p126_p4 = scmp.eq.s32.totalorder %s1127_s20, 1 }
   0x9   : > { %s1494_s24 = scalar_select %p107_p1, %s1420_s17, %s109_s22  }
   0xa   : > { %p1496_p5 = por %p120_p2, %p119_p0  ;;  %p1500_p6 = por %p126_p4, %p125_p3 }
   0xb   : > { %p1128_p7 = scmp.ge.s32.totalorder %s1424_s18, 1  ;;  %p133_p8 = scmp.lt.s32.totalorder %s1424_s18, 3 }
   0xc   : > { %s1965_s25 = scalar_select %p1496_p5, 1, 0 }
   0xd   : > { %s1966_s26 = scalar_select %p1500_p6, 1, 0 }
   0xe   : > { %p1962_p9 = scmp.eq.s32.totalorder %s1479_s19, 0  ;;  %p1507_p10 = pnand %p1128_p7, %p133_p8 }
   0xf   : > { %s1426_s28 = smov [#allocation2]   ;;  %s1330_s7 = scalar_lea.hbm %s1960_s3, 2048 }
  0x10   : > { %s1967_s27 = scalar_select %p1507_p10, 1, 0 }
  0x11   : > { %s154_s29 = sshll.u32 %s1426_s28, 4  ;;  %p1153_p11 = pneg %p1507_p10  ;;  %s155_s29 = int_to_ptr.vmem [resolvable:$true] %s154_s29 }
  0x12   : > { %p1331_p13 = scmp.ne.s32.totalorder %s1960_s3, %s1330_s7  ;;  %p1337_p3 = scmp.lt.u32.totalorder %s1330_s7, %s1960_s3 }
  0x13   : > { %p1515_p12 = pnand %p1962_p9, %p1153_p11 }
  0x15   : > { %p1332_p0 = pneg %p1515_p12 }
  0x17   : > { %p1333_p1 = pnand %p1332_p0, %p1331_p13 }
  0x19   : > { %p1334_p2 = pneg %p1333_p1 }
  0x1b   : > { %p1339_p4 = pnand %p1337_p3, %p1334_p2 }
  0x1d   : > { %1342 = shalt.err (!%p1339_p4)
}
  0x1e   : > { %s1343_s12 = scalar_lea.vmem %s155_s29, 2048  ;;  %p1351_p9 = scmp.lt.s32.totalorder %s155_s29, %s155_s29 }
  0x1f   : > { %p1344_p7 = scmp.ne.s32.totalorder %s155_s29, %s1343_s12  ;;  %p1352_p6 = scmp.lt.s32.totalorder %s1343_s12, %s1343_s12 }
  0x21   : > { %p1346_p8 = pnand %p1344_p7, %p1332_p0  ;;  %p1353_p5 = por %p1352_p6, %p1351_p9 }
  0x23   : > { %p1347_p11 = pneg %p1346_p8 }
  0x25   : > { %p1354_p10 = pnand %p1353_p5, %p1347_p11 }
  0x27   : > { %1357 = shalt.err (!%p1354_p10)
}
  0x28   : > { %s1427_s13 = smov 128   ;;  %s1428_s14 = smov 8  }
  0x29   : > { %1156 = dma.hbm_to_vmem [thread:$0]  (!%p1515_p12), %s1960_s3, 2048, %s155_s29, [#allocation3], %s1427_s13, %s1427_s13, %s1428_s14  }
  0x2a   : > { %p1969_p13 = scmp.ne.s32.totalorder %s1967_s27, 0 }
  0x2b   : > { %p1970_p1 = scmp.eq.s32.totalorder (!%p1969_p13), %s1479_s19, 0 }
  0x2c   : > { %170 = sbr.rel (%p1969_p13) target bundleno = 890 (0x37a), region = 36 }
  0x33   : > { %1403 = dma.done.wait (%p1970_p1), [#allocation3], 2048   ;;  %p1971_p0 = pmov %p1970_p1 }
  0x34   : > { %v1429_v0 = vmov 0   ;;  %v209_v1 = vld [vmem:[%s1958_s1 + $0x8] sm:$0xff]  ;;  %v211_v2 = vld [vmem:[%s1958_s1 + $0x18] sm:$0xff]  ;;  %v208_v3 = vld [vmem:[%s1958_s1] sm:$0xff]  ;;  %vm240_vm0 = vcmask 523264   ;;  %v396_v49 = vlaneseq  ;;  %s686_s20 = scvt.s32.f32 %s1479_s19  ;;  %s188_s23 = sand.u32 1, %s1416_s16  }
  0x35   : > { %1405 = vsyncadd (%p1971_p0), [#allocation3], 4294965248  ;;  %297 = vmatprep.mubr.bf16.mxu1 %v1429_v0  ;;  %858 = vmatprep.mubr.bf16.mxu0 %v1429_v0  ;;  %v233_v4 = vpack.c.bf16 %v211_v2, %v209_v1  ;;  %v210_v5 = vld [vmem:[%s1958_s1 + $0x10] sm:$0xff]  ;;  %v213_v6 = vld [vmem:[%s1958_s1 + $0x28] sm:$0xff]  ;;  %s1132_s28 = sshll.u32 %s188_s23, 8  ;;  %s1146_s29 = sshll.u32 %s1479_s19, 12 }
  0x36   : > { %v215_v7 = vld [vmem:[%s1958_s1 + $0x38] sm:$0xff]  ;;  %v232_v8 = vpack.c.bf16 %v210_v5, %v208_v3  ;;  %v212_v10 = vld [vmem:[%s1958_s1 + $0x20] sm:$0xff]  ;;  %v214_v11 = vld [vmem:[%s1958_s1 + $0x30] sm:$0xff]  ;;  %v1654_v50 = vshrl.u32 %v396_v49, 7  ;;  %s687_s22 = ssub.f32 1.0, %s686_s20  ;;  %s1871_s30 = scalar_lea.vmem [#allocation5], %s1132_s28 }
  0x37   : > { %v235_v9 = vpack.c.bf16 %v215_v7, %v213_v6  ;;  %v217_v12 = vld [vmem:[%s1958_s1 + $0x48] sm:$0xff]  ;;  %265 = vmatprep.subr.bf16.mxu1 %v233_v4  ;;  %v219_v13 = vld [vmem:[%s1958_s1 + $0x58] sm:$0xff]  ;;  %v234_v14 = vpack.c.bf16 %v214_v11, %v212_v10  ;;  %v216_v16 = vld [vmem:[%s1958_s1 + $0x40] sm:$0xff]  ;;  %s1065_s27 = sshll.u32 %s1871_s30, 4  ;;  %s1907_s7 = scalar_lea.hbm %s1961_s4, %s1146_s29  ;;  %s1909_s27 = int_to_ptr.vmem [resolvable:$true] %s1065_s27 }
  0x38   : > { %266 = vmatpush1.bf16.msra.mxu1 %v232_v8  ;;  %v237_v15 = vpack.c.bf16 %v219_v13, %v217_v12  ;;  %v218_v17 = vld [vmem:[%s1958_s1 + $0x50] sm:$0xff]  ;;  %v221_v18 = vld [vmem:[%s1958_s1 + $0x68] sm:$0xff]  ;;  %v223_v19 = vld [vmem:[%s1958_s1 + $0x78] sm:$0xff]  ;;  %v500_v51 = vsub.s32 3, %v1654_v50  ;;  %v1664_v56 = vsub.s32 0, %v1654_v50  ;;  %v402_v57 = vsub.s32 2, %v1654_v50 }
  0x39   : > { %267 = vmatprep.subr.bf16.mxu1 %v235_v9  ;;  %v236_v20 = vpack.c.bf16 %v218_v17, %v216_v16  ;;  %v239_v21 = vpack.c.bf16 %v223_v19, %v221_v18  ;;  %v220_v22 = vld [vmem:[%s1958_s1 + $0x60] sm:$0xff]  ;;  %v222_v23 = vld [vmem:[%s1958_s1 + $0x70] sm:$0xff]  ;;  %v193_v26 = vld [vmem:[%s1957_s0 + $0x8] sm:$0xff]  ;;  %s1916_s19 = scalar_lea.sflag [#allocation4], %s188_s23  ;;  %s1358_s8 = scalar_lea.vmem %s1909_s27, 4096 }
  0x3a   : > { %v238_v24 = vpack.c.bf16 %v222_v23, %v220_v22  ;;  %v192_v25 = vld [vmem:[%s1957_s0] sm:$0xff]  ;;  %v194_v28 = vld [vmem:[%s1957_s0 + $0x10] sm:$0xff]  ;;  %v195_v29 = vld [vmem:[%s1957_s0 + $0x18] sm:$0xff]  ;;  %p1359_p5 = scmp.ne.s32.totalorder %s1909_s27, %s1358_s8  ;;  %p1972_p6 = scmp.ne.s32.totalorder %s1965_s25, 0 }
  0x3b   : > { %v224_v27 = vpack.c.bf16 %v193_v26, %v192_v25  ;;  %v225_v30 = vpack.c.bf16 %v195_v29, %v194_v28  ;;  %v196_v31 = vld [vmem:[%s1957_s0 + $0x20] sm:$0xff]  ;;  %v197_v32 = vld [vmem:[%s1957_s0 + $0x28] sm:$0xff]  ;;  %v198_v34 = vld [vmem:[%s1957_s0 + $0x30] sm:$0xff]  ;;  %s1430_s9 = smov [#allocation5]  }
  0x3c   : > { %268 = vmatpush1.bf16.msra.mxu1 %v234_v14  ;;  %v226_v33 = vpack.c.bf16 %v197_v32, %v196_v31  ;;  %v199_v35 = vld [vmem:[%s1957_s0 + $0x38] sm:$0xff]  ;;  %v200_v37 = vld [vmem:[%s1957_s0 + $0x40] sm:$0xff]  ;;  %v201_v38 = vld [vmem:[%s1957_s0 + $0x48] sm:$0xff]  ;;  %p1360_p9 = pnand %p1359_p5, %p1972_p6  ;;  %s1362_s10 = sshll.u32 %s1430_s9, 4  ;;  %s1363_s10 = int_to_ptr.vmem [resolvable:$false] %s1362_s10 }
  0x3d   : > { %269 = vmatprep.subr.bf16.mxu1 %v237_v15  ;;  %v227_v36 = vpack.c.bf16 %v199_v35, %v198_v34  ;;  %v228_v39 = vpack.c.bf16 %v201_v38, %v200_v37  ;;  %v202_v40 = vld [vmem:[%s1957_s0 + $0x50] sm:$0xff]  ;;  %v203_v41 = vld [vmem:[%s1957_s0 + $0x58] sm:$0xff]  ;;  %v204_v43 = vld [vmem:[%s1957_s0 + $0x60] sm:$0xff]  ;;  %s1364_s11 = scalar_lea.vmem %s1363_s10, 8192  ;;  %p1365_p12 = scmp.lt.s32.totalorder %s1909_s27, %s1363_s10 }
  0x3e   : > { %v229_v42 = vpack.c.bf16 %v203_v41, %v202_v40  ;;  %v205_v44 = vld [vmem:[%s1957_s0 + $0x68] sm:$0xff]  ;;  %v206_v46 = vld [vmem:[%s1957_s0 + $0x70] sm:$0xff]  ;;  %v207_v47 = vld [vmem:[%s1957_s0 + $0x78] sm:$0xff]  ;;  %p1361_p10 = pneg %p1360_p9  ;;  %p1366_p2 = scmp.lt.s32.totalorder %s1364_s11, %s1358_s8 }
  0x3f   : > { %v230_v45 = vpack.c.bf16 %v205_v44, %v204_v43  ;;  %v231_v48 = vpack.c.bf16 %v207_v47, %v206_v46  ;;  %v1660_v52 = vld [vmem:[%s1959_s2] sm:$0xf] }
  0x40   : > { %270 = vmatpush1.bf16.msra.mxu1 %v236_v20  ;;  %v501_v53 = vrot.slane %v1660_v52, %v500_v51  ;;  %v399_v58 = vrot.slane %v1660_v52, %v1664_v56  ;;  %v403_v59 = vrot.slane %v1660_v52, %v402_v57  ;;  %p1367_p3 = por %p1366_p2, %p1365_p12 }
  0x41   : > { %271 = vmatprep.subr.bf16.mxu1 %v239_v21 }
  0x42   : > { %v505_v54 = vpack.c.bf16 %v501_v53, %v501_v53  ;;  %v1671_v60 = vrot.slane %v399_v58, %v1664_v56  ;;  %v1674_v61 = vrot.slane %v403_v59, %v1664_v56  ;;  %p1368_p4 = pnand %p1367_p3, %p1361_p10 }
  0x44   : > { %272 = vmatpush1.bf16.msra.mxu1 %v238_v24  ;;  %v510_v55 = vshrl.u32 %v505_v54, 16 }
  0x47   : > { %1133 = vmatmul.mubr.msk.bf16.vlgmr.msra.gmra.mrb[0].mxu1 %vm240_vm0, %v224_v27 }
  0x48   : > { %307 = vmatprep.mubr.bf16.mxu1 %v1429_v0 }
  0x4f   : > { %1134 = vmatmul.mubr.msk.bf16.gmra.mrb[4].mxu1 %vm240_vm0, %v225_v30 }
  0x50   : > { %317 = vmatprep.mubr.bf16.mxu1 %v1429_v0 }
  0x57   : > { %1135 = vmatmul.mubr.msk.bf16.gmra.mrb[8].mxu1 %vm240_vm0, %v226_v33 }
  0x58   : > { %327 = vmatprep.mubr.bf16.mxu1 %v1429_v0 }
  0x5f   : > { %1136 = vmatmul.mubr.msk.bf16.gmra.mrb[12].mxu1 %vm240_vm0, %v227_v36 }
  0x60   : > { %337 = vmatprep.mubr.bf16.mxu1 %v1429_v0 }
  0x67   : > { %1137 = vmatmul.mubr.msk.bf16.gmra.mrb[16].mxu1 %vm240_vm0, %v228_v39 }
  0x68   : > { %347 = vmatprep.mubr.bf16.mxu1 %v1429_v0 }
  0x6f   : > { %1138 = vmatmul.mubr.msk.bf16.gmra.mrb[20].mxu1 %vm240_vm0, %v229_v42 }
  0x70   : > { %357 = vmatprep.mubr.bf16.mxu1 %v1429_v0 }
  0x77   : > { %1139 = vmatmul.mubr.msk.bf16.gmra.mrb[24].mxu1 %vm240_vm0, %v230_v45 }
  0x78   : > { %367 = vmatprep.mubr.bf16.mxu1 %v1429_v0 }
  0x7f   : > { %1140 = vmatmul.mubr.msk.bf16.gmra.mrb[28].mxu1 %vm240_vm0, %v231_v48 }
  0x80   : > { %546 = vmatprep.mubr.bf16.mxu1 %v510_v55 }
 0x11a   : > { %v299_v62 = vpop.f32.mrb[0].mxu1 }
 0x11b   : > { %v414_v63 = vmul.f32 %v1671_v60, %v299_v62  ;;  %v301_v1 = vpop.f32.mrb[1].mxu1 }
 0x11c   : > { %v415_v2 = vmul.f32 %v1674_v61, %v301_v1  ;;  %v303_v3 = vpop.f32.mrb[2].mxu1 }
 0x11d   : > { %v378_v4 = vpack.c.bf16 %v303_v3, %v299_v62  ;;  %v416_v5 = vmul.f32 %v1671_v60, %v303_v3  ;;  %v305_v6 = vpop.f32.mrb[3].mxu1 }
 0x11e   : > { %v379_v7 = vpack.c.bf16 %v305_v6, %v301_v1  ;;  %v417_v8 = vmul.f32 %v1674_v61, %v305_v6  ;;  %v446_v9 = vadd.f32 %v415_v2, %v414_v63 }
 0x120   : > { %447 = vadd.xlane.f32.xlu0 %v446_v9  ;;  %514 = vmatprep.subr.bf16.mxu1 %v379_v7  ;;  %v449_v10 = vadd.f32 %v417_v8, %v416_v5 }
 0x121   : > { %826 = vmatprep.subr.bf16.mxu0 %v379_v7  ;;  %515 = vmatpush1.bf16.xpose.msra.mxu1 %v378_v4 }
 0x122   : > { %827 = vmatpush1.bf16.msra.mxu0 %v378_v4  ;;  %v309_v11 = vpop.f32.mrb[4].mxu1 }
 0x123   : > { %v418_v12 = vmul.f32 %v1671_v60, %v309_v11  ;;  %v311_v13 = vpop.f32.mrb[5].mxu1 }
 0x124   : > { %v419_v14 = vmul.f32 %v1674_v61, %v311_v13  ;;  %450 = vadd.xlane.f32.xlu0 %v449_v10  ;;  %v313_v15 = vpop.f32.mrb[6].mxu1 }
 0x125   : > { %v380_v16 = vpack.c.bf16 %v313_v15, %v309_v11  ;;  %v420_v17 = vmul.f32 %v1671_v60, %v313_v15  ;;  %v315_v18 = vpop.f32.mrb[7].mxu1 }
 0x126   : > { %v381_v19 = vpack.c.bf16 %v315_v18, %v311_v13  ;;  %v421_v20 = vmul.f32 %v1674_v61, %v315_v18  ;;  %v452_v21 = vadd.f32 %v419_v14, %v418_v12 }
 0x128   : > { %453 = vadd.xlane.f32.xlu1 %v452_v21  ;;  %516 = vmatprep.subr.bf16.mxu1 %v381_v19  ;;  %v455_v22 = vadd.f32 %v421_v20, %v420_v17 }
 0x129   : > { %828 = vmatprep.subr.bf16.mxu0 %v381_v19  ;;  %517 = vmatpush1.bf16.xpose.msra.mxu1 %v380_v16 }
 0x12a   : > { %829 = vmatpush1.bf16.msra.mxu0 %v380_v16  ;;  %v319_v23 = vpop.f32.mrb[8].mxu1 }
 0x12b   : > { %v422_v24 = vmul.f32 %v1671_v60, %v319_v23  ;;  %v321_v25 = vpop.f32.mrb[9].mxu1 }
 0x12c   : > { %v423_v26 = vmul.f32 %v1674_v61, %v321_v25  ;;  %456 = vadd.xlane.f32.xlu1 %v455_v22  ;;  %v323_v27 = vpop.f32.mrb[10].mxu1 }
 0x12d   : > { %v382_v28 = vpack.c.bf16 %v323_v27, %v319_v23  ;;  %v424_v29 = vmul.f32 %v1671_v60, %v323_v27  ;;  %v325_v30 = vpop.f32.mrb[11].mxu1 }
 0x12e   : > { %v383_v31 = vpack.c.bf16 %v325_v30, %v321_v25  ;;  %v425_v32 = vmul.f32 %v1674_v61, %v325_v30  ;;  %v458_v33 = vadd.f32 %v423_v26, %v422_v24  ;;  %v496_v25 = vsub.s32 1, %v1654_v50 }
 0x130   : > { %459 = vadd.xlane.f32.xlu0 %v458_v33  ;;  %518 = vmatprep.subr.bf16.mxu1 %v383_v31  ;;  %v461_v34 = vadd.f32 %v425_v32, %v424_v29 }
 0x131   : > { %830 = vmatprep.subr.bf16.mxu0 %v383_v31  ;;  %519 = vmatpush1.bf16.xpose.msra.mxu1 %v382_v28  ;;  %v497_v31 = vrot.slane %v1660_v52, %v496_v25  ;;  %v1713_v52 = vld [vmem:[#allocation2 + $0x8] sm:$0xff] }
 0x132   : > { %831 = vmatpush1.bf16.msra.mxu0 %v382_v28  ;;  %462 = vadd.xlane.f32.xlu1 %v461_v34  ;;  %v329_v35 = vpop.f32.mrb[12].mxu1 }
 0x133   : > { %v426_v36 = vmul.f32 %v1671_v60, %v329_v35  ;;  %v331_v37 = vpop.f32.mrb[13].mxu1 }
 0x134   : > { %v427_v38 = vmul.f32 %v1674_v61, %v331_v37  ;;  %v333_v39 = vpop.f32.mrb[14].mxu1 }
 0x135   : > { %v384_v40 = vpack.c.bf16 %v333_v39, %v329_v35  ;;  %v428_v41 = vmul.f32 %v1671_v60, %v333_v39  ;;  %v335_v42 = vpop.f32.mrb[15].mxu1 }
 0x136   : > { %v385_v43 = vpack.c.bf16 %v335_v42, %v331_v37  ;;  %v429_v44 = vmul.f32 %v1674_v61, %v335_v42  ;;  %v464_v45 = vadd.f32 %v427_v38, %v426_v36  ;;  %v504_v38 = vpack.c.bf16 %v497_v31, %v497_v31  ;;  %v1725_v42 = vld [vmem:[#allocation2 + $0x28] sm:$0xff] }
 0x138   : > { %465 = vadd.xlane.f32.xlu0 %v464_v45  ;;  %520 = vmatprep.subr.bf16.mxu1 %v385_v43  ;;  %v467_v46 = vadd.f32 %v429_v44, %v428_v41  ;;  %v507_v39 = vshrl.u32 %v504_v38, 16  ;;  %v1722_v41 = vld [vmem:[#allocation2 + $0x20] sm:$0xff]  ;;  %v1731_v44 = vld [vmem:[#allocation2 + $0x38] sm:$0xff] }
 0x139   : > { %832 = vmatprep.subr.bf16.mxu0 %v385_v43  ;;  %521 = vmatpush1.bf16.xpose.msra.mxu1 %v384_v40  ;;  %v1728_v43 = vld [vmem:[#allocation2 + $0x30] sm:$0xff]  ;;  %v1734_v45 = vld [vmem:[#allocation2 + $0x40] sm:$0xff] }
 0x13a   : > { %833 = vmatpush1.bf16.msra.mxu0 %v384_v40  ;;  %468 = vadd.xlane.f32.xlu1 %v467_v46  ;;  %v339_v47 = vpop.f32.mrb[16].mxu1  ;;  %v1710_v40 = vld [vmem:[#allocation2] sm:$0xff]  ;;  %v1737_v46 = vld [vmem:[#allocation2 + $0x48] sm:$0xff] }
 0x13b   : > { %v430_v48 = vmul.f32 %v1671_v60, %v339_v47  ;;  %v341_v49 = vpop.f32.mrb[17].mxu1 }
 0x13c   : > { %v431_v51 = vmul.f32 %v1674_v61, %v341_v49  ;;  %v343_v53 = vpop.f32.mrb[18].mxu1 }
 0x13d   : > { %v386_v54 = vpack.c.bf16 %v343_v53, %v339_v47  ;;  %v432_v55 = vmul.f32 %v1671_v60, %v343_v53  ;;  %v345_v57 = vpop.f32.mrb[19].mxu1  ;;  %v1740_v47 = vld [vmem:[#allocation2 + $0x50] sm:$0xff] }
 0x13e   : > { %v387_v58 = vpack.c.bf16 %v345_v57, %v341_v49  ;;  %v433_v59 = vmul.f32 %v1674_v61, %v345_v57  ;;  %v470_v62 = vadd.f32 %v431_v51, %v430_v48  ;;  %v1743_v48 = vld [vmem:[#allocation2 + $0x58] sm:$0xff]  ;;  %v1746_v49 = vld [vmem:[#allocation2 + $0x60] sm:$0xff]  ;;  %v1749_v51 = vld [vmem:[#allocation2 + $0x68] sm:$0xff] }
 0x13f   : > { %v1752_v53 = vld [vmem:[#allocation2 + $0x70] sm:$0xff] }
 0x140   : > { %471 = vadd.xlane.f32.xlu0 %v470_v62  ;;  %522 = vmatprep.subr.bf16.mxu1 %v387_v58  ;;  %v473_v63 = vadd.f32 %v433_v59, %v432_v55 }
 0x141   : > { %834 = vmatprep.subr.bf16.mxu0 %v387_v58  ;;  %523 = vmatpush1.bf16.xpose.msra.mxu1 %v386_v54 }
 0x142   : > { %835 = vmatpush1.bf16.msra.mxu0 %v386_v54  ;;  %474 = vadd.xlane.f32.xlu1 %v473_v63  ;;  %v349_v1 = vpop.f32.mrb[20].mxu1  ;;  %v1755_v54 = vld [vmem:[#allocation2 + $0x78] sm:$0xff] }
 0x143   : > { %v434_v2 = vmul.f32 %v1671_v60, %v349_v1  ;;  %v351_v3 = vpop.f32.mrb[21].mxu1 }
 0x144   : > { %v435_v4 = vmul.f32 %v1674_v61, %v351_v3  ;;  %v353_v5 = vpop.f32.mrb[22].mxu1 }
 0x145   : > { %v388_v6 = vpack.c.bf16 %v353_v5, %v349_v1  ;;  %v436_v7 = vmul.f32 %v1671_v60, %v353_v5  ;;  %v355_v8 = vpop.f32.mrb[23].mxu1 }
 0x146   : > { %v389_v9 = vpack.c.bf16 %v355_v8, %v351_v3  ;;  %v437_v10 = vmul.f32 %v1674_v61, %v355_v8  ;;  %v476_v11 = vadd.f32 %v435_v4, %v434_v2 }
 0x148   : > { %477 = vadd.xlane.f32.xlu0 %v476_v11  ;;  %524 = vmatprep.subr.bf16.mxu1 %v389_v9  ;;  %v479_v12 = vadd.f32 %v437_v10, %v436_v7 }
 0x149   : > { %836 = vmatprep.subr.bf16.mxu0 %v389_v9  ;;  %525 = vmatpush1.bf16.xpose.msra.mxu1 %v388_v6 }
 0x14a   : > { %837 = vmatpush1.bf16.msra.mxu0 %v388_v6  ;;  %480 = vadd.xlane.f32.xlu1 %v479_v12  ;;  %v359_v13 = vpop.f32.mrb[24].mxu1 }
 0x14b   : > { %v438_v14 = vmul.f32 %v1671_v60, %v359_v13  ;;  %v361_v15 = vpop.f32.mrb[25].mxu1 }
 0x14c   : > { %v439_v16 = vmul.f32 %v1674_v61, %v361_v15  ;;  %v363_v17 = vpop.f32.mrb[26].mxu1 }
 0x14d   : > { %v390_v18 = vpack.c.bf16 %v363_v17, %v359_v13  ;;  %v440_v19 = vmul.f32 %v1671_v60, %v363_v17  ;;  %v365_v20 = vpop.f32.mrb[27].mxu1 }
 0x14e   : > { %v391_v21 = vpack.c.bf16 %v365_v20, %v361_v15  ;;  %v441_v22 = vmul.f32 %v1674_v61, %v365_v20  ;;  %v482_v23 = vadd.f32 %v439_v16, %v438_v14 }
 0x150   : > { %483 = vadd.xlane.f32.xlu0 %v482_v23  ;;  %526 = vmatprep.subr.bf16.mxu1 %v391_v21  ;;  %v485_v24 = vadd.f32 %v441_v22, %v440_v19 }
 0x151   : > { %838 = vmatprep.subr.bf16.mxu0 %v391_v21  ;;  %527 = vmatpush1.bf16.xpose.msra.mxu1 %v390_v18 }
 0x152   : > { %839 = vmatpush1.bf16.msra.mxu0 %v390_v18  ;;  %486 = vadd.xlane.f32.xlu1 %v485_v24  ;;  %v369_v26 = vpop.f32.mrb[28].mxu1 }
 0x153   : > { %v442_v27 = vmul.f32 %v1671_v60, %v369_v26  ;;  %v371_v28 = vpop.f32.mrb[29].mxu1 }
 0x154   : > { %v443_v29 = vmul.f32 %v1674_v61, %v371_v28  ;;  %v373_v30 = vpop.f32.mrb[30].mxu1 }
 0x155   : > { %v392_v32 = vpack.c.bf16 %v373_v30, %v369_v26  ;;  %v444_v33 = vmul.f32 %v1671_v60, %v373_v30  ;;  %v375_v34 = vpop.f32.mrb[31].mxu1  ;;  %v1716_v60 = vld [vmem:[#allocation2 + $0x10] sm:$0xff] }
 0x156   : > { %v393_v35 = vpack.c.bf16 %v375_v34, %v371_v28  ;;  %v445_v50 = vmul.f32 %v1674_v61, %v375_v34  ;;  %v488_v36 = vadd.f32 %v443_v29, %v442_v27  ;;  %v1719_v61 = vld [vmem:[#allocation2 + $0x18] sm:$0xff]  ;;  %v1781_v28 = vstv %s687_s22 }
 0x158   : > { %489 = vadd.xlane.f32.xlu1 %v488_v36  ;;  %528 = vmatprep.subr.bf16.mxu1 %v393_v35  ;;  %v491_v37 = vadd.f32 %v445_v50, %v444_v33 }
 0x159   : > { %840 = vmatprep.subr.bf16.mxu0 %v393_v35  ;;  %529 = vmatpush1.bf16.xpose.msra.mxu1 %v392_v32 }
 0x15a   : > { %841 = vmatpush1.bf16.msra.mxu0 %v392_v32  ;;  %v1784_v32 = vstv %s686_s20 }
 0x15c   : > { %492 = vadd.xlane.f32.xlu1 %v491_v37 }
 0x160   : > { %547 = vmatmul.mubr.bf16.vlgmr.msra.gmra.mrb[32].mxu1 %v507_v39 }
 0x17d   : > { %705 = vxpose.xlu0.b32.start [1/16] %v1710_v40, 128 }
 0x181   : > { %706 = vxpose.xlu0.b32.cont [2/16] %v1713_v52, 128 }
 0x185   : > { %707 = vxpose.xlu0.b32.cont [3/16] %v1716_v60, 128 }
 0x189   : > { %708 = vxpose.xlu0.b32.cont [4/16] %v1719_v61, 128 }
 0x18d   : > { %709 = vxpose.xlu0.b32.cont [5/16] %v1722_v41, 128 }
 0x191   : > { %710 = vxpose.xlu0.b32.cont [6/16] %v1725_v42, 128 }
 0x195   : > { %711 = vxpose.xlu0.b32.cont [7/16] %v1728_v43, 128 }
 0x199   : > { %712 = vxpose.xlu0.b32.cont [8/16] %v1731_v44, 128 }
 0x19d   : > { %713 = vxpose.xlu0.b32.cont [9/16] %v1734_v45, 128 }
 0x1a1   : > { %714 = vxpose.xlu0.b32.cont [10/16] %v1737_v46, 128 }
 0x1a5   : > { %715 = vxpose.xlu0.b32.cont [11/16] %v1740_v47, 128 }
 0x1a9   : > { %716 = vxpose.xlu0.b32.cont [12/16] %v1743_v48, 128 }
 0x1ad   : > { %717 = vxpose.xlu0.b32.cont [13/16] %v1746_v49, 128  ;;  %v448_v55 = vpop.xlane.xlu0 %447 }
 0x1b1   : > { %718 = vxpose.xlu0.b32.cont [14/16] %v1749_v51, 128  ;;  %v451_v57 = vpop.xlane.xlu0 %450 }
 0x1b5   : > { %719 = vxpose.xlu0.b32.cont [15/16] %v1752_v53, 128  ;;  %v454_v6 = vpop.xlane.xlu1 %453 }
 0x1b9   : > { %720 = vxpose.xlu0.b32.end [16/16] %v1755_v54, 128  ;;  %v457_v15 = vpop.xlane.xlu1 %456 }
 0x1bd   : > { %v460_v58 = vpop.xlane.xlu0 %459 }
 0x1bf   : > { %v463_v24 = vpop.xlane.xlu1 %462 }
 0x1c5   : > { %v466_v59 = vpop.xlane.xlu0 %465 }
 0x1c7   : > { %v469_v36 = vpop.xlane.xlu1 %468 }
 0x1cd   : > { %v1758_v62 = vpop.xlane.xlu0 %471 }
 0x1d5   : > { %v1760_v63 = vpop.xlane.xlu0 %477 }
 0x1dd   : > { %v1762_v1 = vpop.xlane.xlu0 %483 }
 0x1fd   : > { %v721_v2 = vpop.trf.xlu0 }
 0x201   : > { %v722_v3 = vpop.trf.xlu0 }
 0x205   : > { %v1764_v4 = vpop.trf.xlu0 }
 0x209   : > { %v1766_v5 = vpop.trf.xlu0 }
 0x20d   : > { %v1771_v12 = vpop.trf.xlu0 }
 0x211   : > { %v1778_v19 = vpop.trf.xlu0 }
 0x215   : > { %v1786_v37 = vpop.trf.xlu0 }
 0x233   : > { %v548_v7 = vpop.f32.mrb[32].mxu1 }
 0x234   : > { %v1769_v8 = vrot.slane %v548_v7, %v1664_v56  ;;  %v550_v9 = vpop.f32.mrb[33].mxu1  ;;  %v689_v7 = vmul.f32 %v1781_v28, %v1710_v40  ;;  %v691_v40 = vmul.f32 %v1781_v28, %v1716_v60 }
 0x235   : > { %v551_v10 = vpop.f32.mrb[34].mxu1  ;;  %v690_v9 = vmul.f32 %v1781_v28, %v1713_v52 }
 0x236   : > { %v552_v11 = vpop.f32.mrb[35].mxu1  ;;  %v558_v13 = vadd.f32 %v1769_v8, %v448_v55  ;;  %v559_v14 = vadd.f32 %v1769_v8, %v451_v57  ;;  %v560_v16 = vadd.f32 %v1769_v8, %v454_v6  ;;  %v561_v17 = vadd.f32 %v1769_v8, %v457_v15 }
 0x237   : > { %v562_v27 = vadd.f32 %v1769_v8, %v460_v58  ;;  %v563_v31 = vadd.f32 %v1769_v8, %v463_v24  ;;  %v564_v58 = vadd.f32 %v1769_v8, %v466_v59  ;;  %v565_v6 = vadd.f32 %v1769_v8, %v469_v36 }
 0x238   : > { %vm574_vm1 = vcmp.gt.f32.partialorder %v558_v13, 0.0  ;;  %vm575_vm2 = vcmp.gt.f32.partialorder %v559_v14, 0.0  ;;  %v590_v18 = vmul.f32 0.1, %v558_v13  ;;  %v591_v56 = vmul.f32 0.1, %v559_v14 }
 0x239   : > { %vm576_vm3 = vcmp.gt.f32.partialorder %v560_v16, 0.0  ;;  %vm577_vm4 = vcmp.gt.f32.partialorder %v561_v17, 0.0  ;;  %v592_v23 = vmul.f32 0.1, %v560_v16  ;;  %v593_v26 = vmul.f32 0.1, %v561_v17 }
 0x23a   : > { %v606_v20 = vsel %vm574_vm1, %v558_v13, %v590_v18  ;;  %v607_v21 = vsel %vm575_vm2, %v559_v14, %v591_v56  ;;  %vm578_vm5 = vcmp.gt.f32.partialorder %v562_v27, 0.0  ;;  %vm579_vm6 = vcmp.gt.f32.partialorder %v563_v31, 0.0  ;;  %v1796_v18 = vpop.trf.xlu0 }
 0x23b   : > { %v622_v22 = vsub.f32 0.0, %v606_v20  ;;  %v623_v25 = vsub.f32 0.0, %v607_v21  ;;  %v608_v30 = vsel %vm576_vm3, %v560_v16, %v592_v23  ;;  %v609_v34 = vsel %vm577_vm4, %v561_v17, %v593_v26  ;;  %v475_v21 = vpop.xlane.xlu1 %474 }
 0x23c   : > { %v624_v35 = vsub.f32 0.0, %v608_v30  ;;  %v625_v50 = vsub.f32 0.0, %v609_v34  ;;  %v594_v39 = vmul.f32 0.1, %v562_v27  ;;  %v595_v55 = vmul.f32 0.1, %v563_v31 }
 0x23d   : > { %v638_v29 = vmul.f32 1.442695, %v622_v22  ;;  %v640_v33 = vmul.f32 1.442695, %v623_v25  ;;  %v738_v13 = vmul.f32 %v1784_v32, %v721_v2  ;;  %v739_v14 = vmul.f32 %v1784_v32, %v722_v3 }
 0x23e   : > { %v642_v38 = vmul.f32 1.442695, %v624_v35  ;;  %v644_v57 = vmul.f32 1.442695, %v625_v50  ;;  %v610_v10 = vsel %vm578_vm5, %v562_v27, %v594_v39  ;;  %v611_v11 = vsel %vm579_vm6, %v563_v31, %v595_v55  ;;  %v1809_v34 = vpop.trf.xlu0 }
 0x23f   : > { %1202 = vpow2.f32 %v638_v29  ;;  %v626_v15 = vsub.f32 0.0, %v610_v10  ;;  %v627_v16 = vsub.f32 0.0, %v611_v11  ;;  %v596_v17 = vmul.f32 0.1, %v564_v58 }
 0x240   : > { %1204 = vpow2.f32 %v640_v33  ;;  %vm580_vm7 = vcmp.gt.f32.partialorder %v564_v58, 0.0  ;;  %v597_v59 = vmul.f32 0.1, %v565_v6  ;;  %vm581_vm8 = vcmp.gt.f32.partialorder %v565_v6, 0.0 }
 0x241   : > { %1206 = vpow2.f32 %v642_v38  ;;  %v754_v52 = vadd.f32 %v738_v13, %v689_v7  ;;  %v755_v56 = vadd.f32 %v739_v14, %v690_v9  ;;  %v646_v20 = vmul.f32 1.442695, %v626_v15 }
 0x242   : > { %1208 = vpow2.f32 %v644_v57  ;;  %v740_v2 = vmul.f32 %v1784_v32, %v1764_v4  ;;  %v648_v3 = vmul.f32 1.442695, %v627_v16  ;;  %v612_v22 = vsel %vm580_vm7, %v564_v58, %v596_v17  ;;  %v481_v57 = vpop.xlane.xlu1 %480  ;;  %v730_v15 = vpop.trf.xlu0 }
 0x243   : > { %v566_v23 = vadd.f32 %v1769_v8, %v1758_v62  ;;  %v692_v25 = vmul.f32 %v1781_v28, %v1719_v61  ;;  %v741_v26 = vmul.f32 %v1784_v32, %v1766_v5  ;;  %v613_v60 = vsel %vm581_vm8, %v565_v6, %v597_v59 }
 0x244   : > { %v567_v27 = vadd.f32 %v1769_v8, %v475_v21  ;;  %1210 = vpow2.f32 %v646_v20  ;;  %v628_v4 = vsub.f32 0.0, %v612_v22  ;;  %v756_v33 = vadd.f32 %v740_v2, %v691_v40 }
 0x245   : > { %1212 = vpow2.f32 %v648_v3  ;;  %v629_v62 = vsub.f32 0.0, %v613_v60  ;;  %v598_v35 = vmul.f32 0.1, %v566_v23  ;;  %v757_v61 = vadd.f32 %v741_v26, %v692_v25 }
 0x246   : > { %vm582_vm9 = vcmp.gt.f32.partialorder %v566_v23, 0.0  ;;  %v599_v5 = vmul.f32 0.1, %v567_v27  ;;  %vm583_vm10 = vcmp.gt.f32.partialorder %v567_v27, 0.0  ;;  %v693_v39 = vmul.f32 %v1781_v28, %v1722_v41  ;;  %v487_v40 = vpop.xlane.xlu1 %486 }
 0x247   : > { %v694_v55 = vmul.f32 %v1781_v28, %v1725_v42  ;;  %v742_v58 = vmul.f32 %v1784_v32, %v1771_v12  ;;  %v650_v6 = vmul.f32 1.442695, %v628_v4  ;;  %v743_v7 = vmul.f32 %v1784_v32, %v1778_v19 }
 0x248   : > { %v569_v9 = vadd.f32 %v1769_v8, %v481_v57  ;;  %v652_v10 = vmul.f32 1.442695, %v629_v62  ;;  %v614_v11 = vsel %vm582_vm9, %v566_v23, %v598_v35  ;;  %v615_v14 = vsel %vm583_vm10, %v567_v27, %v599_v5 }
 0x249   : > { %v1203_v24 = vpop.eup %1202  ;;  %v568_v42 = vadd.f32 %v1769_v8, %v1760_v63  ;;  %1214 = vpow2.f32 %v650_v6  ;;  %v630_v12 = vsub.f32 0.0, %v614_v11  ;;  %v758_v16 = vadd.f32 %v742_v58, %v693_v39 }
 0x24a   : > { %v1205_v29 = vpop.eup %1204  ;;  %v770_v30 = vmul.f32 %v1203_v24, %v754_v52  ;;  %v601_v17 = vmul.f32 0.1, %v569_v9  ;;  %1216 = vpow2.f32 %v652_v10  ;;  %v631_v19 = vsub.f32 0.0, %v615_v14  ;;  %v731_v24 = vpop.trf.xlu0 }
 0x24b   : > { %v771_v31 = vmul.f32 %v1205_v29, %v755_v56  ;;  %v1207_v50 = vpop.eup %1206  ;;  %v759_v52 = vadd.f32 %v743_v7, %v694_v55  ;;  %vm585_vm11 = vcmp.gt.f32.partialorder %v569_v9, 0.0  ;;  %v600_v20 = vmul.f32 0.1, %v568_v42 }
 0x24c   : > { %786 = vadd.xlane.f32.xlu1 %v770_v30  ;;  %v1209_v38 = vpop.eup %1208  ;;  %v772_v41 = vmul.f32 %v1207_v50, %v756_v33  ;;  %vm584_vm12 = vcmp.gt.f32.partialorder %v568_v42, 0.0  ;;  %v695_v2 = vmul.f32 %v1781_v28, %v1728_v43  ;;  %v696_v63 = vmul.f32 %v1781_v28, %v1731_v44  ;;  %v490_v43 = vpop.xlane.xlu1 %489 }
 0x24d   : > { %v818_v36 = vpack.c.bf16 %v771_v31, %v770_v30  ;;  %v773_v13 = vmul.f32 %v1209_v38, %v757_v61  ;;  %v744_v3 = vmul.f32 %v1784_v32, %v1786_v37  ;;  %v654_v22 = vmul.f32 1.442695, %v630_v12 }
 0x24e   : > { %v1211_v59 = vpop.eup %1210  ;;  %v745_v23 = vmul.f32 %v1784_v32, %v1796_v18  ;;  %v617_v25 = vsel %vm585_vm11, %v569_v9, %v601_v17  ;;  %v571_v26 = vadd.f32 %v1769_v8, %v487_v40  ;;  %v656_v60 = vmul.f32 1.442695, %v631_v19 }
 0x24f   : > { %859 = vmatmul.mubr.bf16.vlgmr.msra.gmra.mrb[0].mxu0 %v818_v36  ;;  %v819_v56 = vpack.c.bf16 %v773_v13, %v772_v41  ;;  %v1213_v21 = vpop.eup %1212  ;;  %v774_v27 = vmul.f32 %v1211_v59, %v758_v16  ;;  %v616_v44 = vsel %vm584_vm12, %v568_v42, %v600_v20  ;;  %v570_v37 = vadd.f32 %v1769_v8, %v1762_v1  ;;  %v732_v36 = vpop.trf.xlu0 }
 0x250   : > { %788 = vadd.xlane.f32.xlu1 %v771_v31  ;;  %868 = vmatprep.mubr.bf16.mxu0 %v1429_v0  ;;  %v775_v29 = vmul.f32 %v1213_v21, %v759_v52  ;;  %v633_v30 = vsub.f32 0.0, %v617_v25  ;;  %1218 = vpow2.f32 %v654_v22  ;;  %v760_v31 = vadd.f32 %v744_v3, %v695_v2  ;;  %v493_v38 = vpop.xlane.xlu1 %492 }
 0x251   : > { %v603_v18 = vmul.f32 0.1, %v571_v26  ;;  %1220 = vpow2.f32 %v656_v60  ;;  %v632_v4 = vsub.f32 0.0, %v616_v44  ;;  %v761_v62 = vadd.f32 %v745_v23, %v696_v63 }
 0x252   : > { %vm587_vm13 = vcmp.gt.f32.partialorder %v571_v26, 0.0  ;;  %v820_v35 = vpack.c.bf16 %v775_v29, %v774_v27  ;;  %v602_v50 = vmul.f32 0.1, %v570_v37  ;;  %vm586_vm14 = vcmp.gt.f32.partialorder %v570_v37, 0.0 }
 0x253   : > { %v1215_v33 = vpop.eup %1214  ;;  %v697_v5 = vmul.f32 %v1781_v28, %v1734_v45  ;;  %v698_v1 = vmul.f32 %v1781_v28, %v1737_v46  ;;  %v746_v39 = vmul.f32 %v1784_v32, %v1809_v34  ;;  %v660_v55 = vmul.f32 1.442695, %v633_v30  ;;  %v733_v34 = vpop.trf.xlu0 }
 0x254   : > { %790 = vadd.xlane.f32.xlu1 %v772_v41  ;;  %v1217_v61 = vpop.eup %1216  ;;  %v747_v57 = vmul.f32 %v1784_v32, %v730_v15  ;;  %v619_v58 = vsel %vm587_vm13, %v571_v26, %v603_v18  ;;  %v573_v6 = vadd.f32 %v1769_v8, %v493_v38  ;;  %v658_v7 = vmul.f32 1.442695, %v632_v4 }
 0x255   : > { %v776_v9 = vmul.f32 %v1215_v33, %v760_v31  ;;  %v777_v45 = vmul.f32 %v1217_v61, %v761_v62  ;;  %v618_v10 = vsel %vm586_vm14, %v570_v37, %v602_v50  ;;  %v572_v46 = vadd.f32 %v1769_v8, %v490_v43 }
 0x256   : > { %1222 = vpow2.f32 %v660_v55  ;;  %v635_v11 = vsub.f32 0.0, %v619_v58  ;;  %v762_v41 = vadd.f32 %v746_v39, %v697_v5  ;;  %v634_v14 = vsub.f32 0.0, %v618_v10 }
 0x257   : > { %869 = vmatmul.mubr.bf16.gmra.mrb[4].mxu0 %v819_v56  ;;  %1224 = vpow2.f32 %v658_v7  ;;  %v763_v15 = vadd.f32 %v747_v57, %v698_v1  ;;  %vm589_vm15 = vcmp.gt.f32.partialorder %v573_v6, 0.0  ;;  %v821_v12 = vpack.c.bf16 %v777_v45, %v776_v9  ;;  %v734_v3 = vpop.trf.xlu0 }
 0x258   : > { %792 = vadd.xlane.f32.xlu1 %v773_v13  ;;  %878 = vmatprep.mubr.bf16.mxu0 %v1429_v0  ;;  %v605_v13 = vmul.f32 0.1, %v573_v6  ;;  %v604_v16 = vmul.f32 0.1, %v572_v46  ;;  %vm588_vm0 = vcmp.gt.f32.partialorder %v572_v46, 0.0  ;;  %v699_v19 = vmul.f32 %v1781_v28, %v1740_v47 }
 0x259   : > { %v664_v59 = vmul.f32 1.442695, %v635_v11  ;;  %v700_v8 = vmul.f32 %v1781_v28, %v1743_v48  ;;  %v748_v40 = vmul.f32 %v1784_v32, %v731_v24  ;;  %v662_v56 = vmul.f32 1.442695, %v634_v14 }
 0x25a   : > { %v1219_v42 = vpop.eup %1218  ;;  %v621_v52 = vsel %vm589_vm15, %v573_v6, %v605_v13  ;;  %v749_v20 = vmul.f32 %v1784_v32, %v732_v36  ;;  %v620_v63 = vsel %vm588_vm0, %v572_v46, %v604_v16  ;;  %v701_v43 = vmul.f32 %v1781_v28, %v1746_v49 }
 0x25b   : > { %v1221_v17 = vpop.eup %1220  ;;  %v778_v21 = vmul.f32 %v1219_v42, %v762_v41  ;;  %1226 = vpow2.f32 %v664_v59  ;;  %v637_v47 = vsub.f32 0.0, %v621_v52  ;;  %v636_v22 = vsub.f32 0.0, %v620_v63 }
 0x25c   : > { %794 = vadd.xlane.f32.xlu1 %v774_v27  ;;  %v779_v2 = vmul.f32 %v1221_v17, %v763_v15  ;;  %1228 = vpow2.f32 %v662_v56  ;;  %v764_v48 = vadd.f32 %v748_v40, %v699_v19  ;;  %v765_v25 = vadd.f32 %v749_v20, %v700_v8 }
 0x25d   : > { %v668_v60 = vmul.f32 1.442695, %v637_v47  ;;  %v702_v27 = vmul.f32 %v1781_v28, %v1749_v51  ;;  %v666_v44 = vmul.f32 1.442695, %v636_v22  ;;  %v750_v30 = vmul.f32 %v1784_v32, %v733_v34 }
 0x25e   : > { %v822_v24 = vpack.c.bf16 %v779_v2, %v778_v21  ;;  %v751_v31 = vmul.f32 %v1784_v32, %v734_v3  ;;  %v703_v50 = vmul.f32 %v1781_v28, %v1752_v53  ;;  %v704_v61 = vmul.f32 %v1781_v28, %v1755_v54 }
 0x25f   : > { %879 = vmatmul.mubr.bf16.gmra.mrb[8].mxu0 %v820_v35  ;;  %1230 = vpow2.f32 %v668_v60  ;;  %v766_v33 = vadd.f32 %v750_v30, %v701_v43 }
 0x260   : > { %796 = vadd.xlane.f32.xlu1 %v775_v29  ;;  %888 = vmatprep.mubr.bf16.mxu0 %v1429_v0  ;;  %v1223_v23 = vpop.eup %1222  ;;  %v735_v29 = vpop.trf.xlu0  ;;  %1232 = vpow2.f32 %v666_v44  ;;  %v767_v49 = vadd.f32 %v751_v31, %v702_v27 }
 0x261   : > { %v1225_v26 = vpop.eup %1224  ;;  %v781_v37 = vmul.f32 %v1223_v23, %v765_v25  ;;  %v752_v5 = vmul.f32 %v1784_v32, %v735_v29 }
 0x262   : > { %v780_v18 = vmul.f32 %v1225_v26, %v764_v48 }
 0x263   : > { %v768_v55 = vadd.f32 %v752_v5, %v703_v50 }
 0x264   : > { %798 = vadd.xlane.f32.xlu1 %v776_v9  ;;  %v823_v62 = vpack.c.bf16 %v781_v37, %v780_v18  ;;  %v736_v51 = vpop.trf.xlu0 }
 0x265   : > { %v1227_v4 = vpop.eup %1226  ;;  %v753_v1 = vmul.f32 %v1784_v32, %v736_v51 }
 0x266   : > { %v1229_v35 = vpop.eup %1228  ;;  %v783_v36 = vmul.f32 %v1227_v4, %v767_v49 }
 0x267   : > { %889 = vmatmul.mubr.bf16.gmra.mrb[12].mxu0 %v821_v12  ;;  %v782_v38 = vmul.f32 %v1229_v35, %v766_v33  ;;  %v769_v57 = vadd.f32 %v753_v1, %v704_v61 }
 0x268   : > { %800 = vadd.xlane.f32.xlu1 %v777_v45  ;;  %898 = vmatprep.mubr.bf16.mxu0 %v1429_v0 }
 0x269   : > { %v1231_v39 = vpop.eup %1230  ;;  %v824_v58 = vpack.c.bf16 %v783_v36, %v782_v38 }
 0x26a   : > { %v1233_v6 = vpop.eup %1232  ;;  %v785_v53 = vmul.f32 %v1231_v39, %v769_v57 }
 0x26b   : > { %v784_v54 = vmul.f32 %v1233_v6, %v768_v55 }
 0x26c   : > { %802 = vadd.xlane.f32.xlu1 %v778_v21 }
 0x26d   : > { %v825_v28 = vpack.c.bf16 %v785_v53, %v784_v54 }
 0x26f   : > { %899 = vmatmul.mubr.bf16.gmra.mrb[16].mxu0 %v822_v24 }
 0x270   : > { %804 = vadd.xlane.f32.xlu1 %v779_v2  ;;  %908 = vmatprep.mubr.bf16.mxu0 %v1429_v0 }
 0x274   : > { %806 = vadd.xlane.f32.xlu1 %v780_v18 }
 0x277   : > { %909 = vmatmul.mubr.bf16.gmra.mrb[20].mxu0 %v823_v62 }
 0x278   : > { %808 = vadd.xlane.f32.xlu1 %v781_v37  ;;  %918 = vmatprep.mubr.bf16.mxu0 %v1429_v0 }
 0x27c   : > { %810 = vadd.xlane.f32.xlu1 %v782_v38 }
 0x27f   : > { %919 = vmatmul.mubr.bf16.gmra.mrb[24].mxu0 %v824_v58 }
 0x280   : > { %812 = vadd.xlane.f32.xlu1 %v783_v36  ;;  %928 = vmatprep.mubr.bf16.mxu0 %v1429_v0 }
 0x284   : > { %814 = vadd.xlane.f32.xlu1 %v784_v54 }
 0x287   : > { %929 = vmatmul.mubr.bf16.gmra.mrb[28].mxu0 %v825_v28 }
 0x288   : > { %816 = vadd.xlane.f32.xlu1 %v785_v53 }
 0x2d9   : > { %v787_v7 = vpop.xlane.xlu1 %786 }
 0x2da   : > { %1234 = vrcp.f32 %v787_v7 }
 0x2dd   : > { %v789_v9 = vpop.xlane.xlu1 %788 }
 0x2de   : > { %1236 = vrcp.f32 %v789_v9 }
 0x2e1   : > { %v791_v32 = vpop.xlane.xlu1 %790 }
 0x2e2   : > { %1238 = vrcp.f32 %v791_v32 }
 0x2e4   : > { %v1235_v34 = vpop.eup %1234 }
 0x2e5   : > { %v793_v45 = vpop.xlane.xlu1 %792 }
 0x2e6   : > { %1240 = vrcp.f32 %v793_v45 }
 0x2e8   : > { %v1237_v42 = vpop.eup %1236 }
 0x2e9   : > { %v795_v10 = vpop.xlane.xlu1 %794 }
 0x2ea   : > { %1242 = vrcp.f32 %v795_v10 }
 0x2ec   : > { %v1239_v8 = vpop.eup %1238 }
 0x2ed   : > { %v797_v46 = vpop.xlane.xlu1 %796 }
 0x2f0   : > { %v1241_v21 = vpop.eup %1240 }
 0x2f1   : > { %v799_v11 = vpop.xlane.xlu1 %798 }
 0x2f4   : > { %v1243_v22 = vpop.eup %1242 }
 0x2f5   : > { %v801_v41 = vpop.xlane.xlu1 %800 }
 0x2f9   : > { %v803_v16 = vpop.xlane.xlu1 %802 }
 0x2fd   : > { %v805_v52 = vpop.xlane.xlu1 %804 }
 0x301   : > { %v807_v26 = vpop.xlane.xlu1 %806 }
 0x305   : > { %v809_v62 = vpop.xlane.xlu1 %808 }
 0x309   : > { %v811_v55 = vpop.xlane.xlu1 %810 }
 0x30d   : > { %v813_v45 = vpop.xlane.xlu1 %812 }
 0x322   : > { %v860_v0 = vpop.f32.mrb[0].mxu0 }
 0x323   : > { %v955_v13 = vmul.f32 %v1235_v34, %v860_v0  ;;  %v862_v14 = vpop.f32.mrb[1].mxu0 }
 0x324   : > { %v956_v15 = vmul.f32 %v1235_v34, %v862_v14  ;;  %v864_v12 = vpop.f32.mrb[2].mxu0 }
 0x325   : > { %1244 = vtanh.f32 %v955_v13  ;;  %v957_v17 = vmul.f32 %v1237_v42, %v864_v12  ;;  %v866_v19 = vpop.f32.mrb[3].mxu0 }
 0x326   : > { %1246 = vtanh.f32 %v956_v15  ;;  %v958_v59 = vmul.f32 %v1237_v42, %v866_v19 }
 0x327   : > { %1248 = vtanh.f32 %v957_v17  ;;  %v815_v17 = vpop.xlane.xlu1 %814 }
 0x328   : > { %1250 = vtanh.f32 %v958_v59 }
 0x329   : > { %1252 = vrcp.f32 %v797_v46 }
 0x32a   : > { %v870_v40 = vpop.f32.mrb[4].mxu0  ;;  %1254 = vrcp.f32 %v799_v11 }
 0x32b   : > { %v959_v56 = vmul.f32 %v1239_v8, %v870_v40  ;;  %v872_v20 = vpop.f32.mrb[5].mxu0 }
 0x32c   : > { %v960_v2 = vmul.f32 %v1239_v8, %v872_v20  ;;  %v874_v63 = vpop.f32.mrb[6].mxu0 }
 0x32d   : > { %1256 = vtanh.f32 %v959_v56  ;;  %v961_v3 = vmul.f32 %v1241_v21, %v874_v63  ;;  %v876_v47 = vpop.f32.mrb[7].mxu0 }
 0x32e   : > { %1258 = vtanh.f32 %v960_v2  ;;  %v962_v23 = vmul.f32 %v1241_v21, %v876_v47 }
 0x32f   : > { %v1245_v48 = vpop.eup %1244  ;;  %1260 = vtanh.f32 %v961_v3 }
 0x330   : > { %v1247_v25 = vpop.eup %1246  ;;  %1019 = vst [vmem:[%s1871_s30] sm:$0xff] %v1245_v48  ;;  %1262 = vtanh.f32 %v962_v23 }
 0x331   : > { %v1249_v24 = vpop.eup %1248  ;;  %1020 = vst [vmem:[%s1871_s30 + $0x8] sm:$0xff] %v1247_v25  ;;  %1264 = vrcp.f32 %v801_v41 }
 0x332   : > { %v1251_v60 = vpop.eup %1250  ;;  %1021 = vst [vmem:[%s1871_s30 + $0x10] sm:$0xff] %v1249_v24  ;;  %v880_v43 = vpop.f32.mrb[8].mxu0  ;;  %1266 = vrcp.f32 %v803_v16 }
 0x333   : > { %1022 = vst [vmem:[%s1871_s30 + $0x18] sm:$0xff] %v1251_v60  ;;  %v963_v27 = vmul.f32 %v1243_v22, %v880_v43  ;;  %v882_v29 = vpop.f32.mrb[9].mxu0  ;;  %v1253_v44 = vpop.eup %1252 }
 0x334   : > { %v964_v37 = vmul.f32 %v1243_v22, %v882_v29  ;;  %v884_v30 = vpop.f32.mrb[10].mxu0  ;;  %v1255_v4 = vpop.eup %1254 }
 0x335   : > { %1268 = vtanh.f32 %v963_v27  ;;  %v965_v31 = vmul.f32 %v1253_v44, %v884_v30  ;;  %v886_v18 = vpop.f32.mrb[11].mxu0  ;;  %v817_v22 = vpop.xlane.xlu1 %816 }
 0x336   : > { %1270 = vtanh.f32 %v964_v37  ;;  %v966_v33 = vmul.f32 %v1253_v44, %v886_v18 }
 0x337   : > { %v1257_v49 = vpop.eup %1256  ;;  %1272 = vtanh.f32 %v965_v31 }
 0x338   : > { %v1259_v35 = vpop.eup %1258  ;;  %1023 = vst [vmem:[%s1871_s30 + $0x20] sm:$0xff] %v1257_v49  ;;  %1274 = vtanh.f32 %v966_v33 }
 0x339   : > { %v1261_v51 = vpop.eup %1260  ;;  %1024 = vst [vmem:[%s1871_s30 + $0x28] sm:$0xff] %v1259_v35  ;;  %1276 = vrcp.f32 %v805_v52 }
 0x33a   : > { %v1263_v50 = vpop.eup %1262  ;;  %1025 = vst [vmem:[%s1871_s30 + $0x30] sm:$0xff] %v1261_v51  ;;  %v890_v61 = vpop.f32.mrb[12].mxu0  ;;  %1278 = vrcp.f32 %v807_v26 }
 0x33b   : > { %1026 = vst [vmem:[%s1871_s30 + $0x38] sm:$0xff] %v1263_v50  ;;  %v967_v36 = vmul.f32 %v1255_v4, %v890_v61  ;;  %v892_v5 = vpop.f32.mrb[13].mxu0  ;;  %v1265_v1 = vpop.eup %1264 }
 0x33c   : > { %v968_v38 = vmul.f32 %v1255_v4, %v892_v5  ;;  %v894_v39 = vpop.f32.mrb[14].mxu0  ;;  %v1267_v6 = vpop.eup %1266 }
 0x33d   : > { %1280 = vtanh.f32 %v967_v36  ;;  %v969_v57 = vmul.f32 %v1265_v1, %v894_v39  ;;  %v896_v58 = vpop.f32.mrb[15].mxu0 }
 0x33e   : > { %1282 = vtanh.f32 %v968_v38  ;;  %v970_v53 = vmul.f32 %v1265_v1, %v896_v58 }
 0x33f   : > { %v1269_v54 = vpop.eup %1268  ;;  %1284 = vtanh.f32 %v969_v57 }
 0x340   : > { %v1271_v28 = vpop.eup %1270  ;;  %1027 = vst [vmem:[%s1871_s30 + $0x40] sm:$0xff] %v1269_v54  ;;  %1286 = vtanh.f32 %v970_v53 }
 0x341   : > { %v1273_v7 = vpop.eup %1272  ;;  %1028 = vst [vmem:[%s1871_s30 + $0x48] sm:$0xff] %v1271_v28  ;;  %1288 = vrcp.f32 %v809_v62 }
 0x342   : > { %v1275_v9 = vpop.eup %1274  ;;  %1029 = vst [vmem:[%s1871_s30 + $0x50] sm:$0xff] %v1273_v7  ;;  %v900_v32 = vpop.f32.mrb[16].mxu0  ;;  %1290 = vrcp.f32 %v811_v55 }
 0x343   : > { %1030 = vst [vmem:[%s1871_s30 + $0x58] sm:$0xff] %v1275_v9  ;;  %v971_v10 = vmul.f32 %v1267_v6, %v900_v32  ;;  %v902_v46 = vpop.f32.mrb[17].mxu0  ;;  %v1277_v11 = vpop.eup %1276 }
 0x344   : > { %v972_v41 = vmul.f32 %v1267_v6, %v902_v46  ;;  %v904_v34 = vpop.f32.mrb[18].mxu0  ;;  %v1279_v14 = vpop.eup %1278 }
 0x345   : > { %1292 = vtanh.f32 %v971_v10  ;;  %v973_v0 = vmul.f32 %v1277_v11, %v904_v34  ;;  %v906_v13 = vpop.f32.mrb[19].mxu0 }
 0x346   : > { %1294 = vtanh.f32 %v972_v41  ;;  %v974_v42 = vmul.f32 %v1277_v11, %v906_v13 }
 0x347   : > { %v1281_v15 = vpop.eup %1280  ;;  %1296 = vtanh.f32 %v973_v0 }
 0x348   : > { %v1283_v12 = vpop.eup %1282  ;;  %1031 = vst [vmem:[%s1871_s30 + $0x60] sm:$0xff] %v1281_v15  ;;  %1298 = vtanh.f32 %v974_v42 }
 0x349   : > { %v1285_v16 = vpop.eup %1284  ;;  %1032 = vst [vmem:[%s1871_s30 + $0x68] sm:$0xff] %v1283_v12  ;;  %1300 = vrcp.f32 %v813_v45 }
 0x34a   : > { %v1287_v19 = vpop.eup %1286  ;;  %1033 = vst [vmem:[%s1871_s30 + $0x70] sm:$0xff] %v1285_v16  ;;  %v910_v59 = vpop.f32.mrb[20].mxu0  ;;  %1302 = vrcp.f32 %v815_v17 }
 0x34b   : > { %1034 = vst [vmem:[%s1871_s30 + $0x78] sm:$0xff] %v1287_v19  ;;  %v975_v8 = vmul.f32 %v1279_v14, %v910_v59  ;;  %v912_v40 = vpop.f32.mrb[21].mxu0  ;;  %v1289_v52 = vpop.eup %1288 }
 0x34c   : > { %v976_v56 = vmul.f32 %v1279_v14, %v912_v40  ;;  %v914_v20 = vpop.f32.mrb[22].mxu0  ;;  %v1291_v63 = vpop.eup %1290 }
 0x34d   : > { %1304 = vtanh.f32 %v975_v8  ;;  %v977_v21 = vmul.f32 %v1289_v52, %v914_v20  ;;  %v916_v2 = vpop.f32.mrb[23].mxu0 }
 0x34e   : > { %1306 = vtanh.f32 %v976_v56  ;;  %v978_v3 = vmul.f32 %v1289_v52, %v916_v2 }
 0x34f   : > { %v1293_v47 = vpop.eup %1292  ;;  %1308 = vtanh.f32 %v977_v21 }
 0x350   : > { %v1295_v23 = vpop.eup %1294  ;;  %1035 = vst [vmem:[%s1871_s30 + $0x80] sm:$0xff] %v1293_v47  ;;  %1310 = vtanh.f32 %v978_v3 }
 0x351   : > { %v1297_v48 = vpop.eup %1296  ;;  %1036 = vst [vmem:[%s1871_s30 + $0x88] sm:$0xff] %v1295_v23  ;;  %1312 = vrcp.f32 %v817_v22 }
 0x352   : > { %v1299_v25 = vpop.eup %1298  ;;  %1037 = vst [vmem:[%s1871_s30 + $0x90] sm:$0xff] %v1297_v48  ;;  %v920_v24 = vpop.f32.mrb[24].mxu0 }
 0x353   : > { %1038 = vst [vmem:[%s1871_s30 + $0x98] sm:$0xff] %v1299_v25  ;;  %v979_v26 = vmul.f32 %v1291_v63, %v920_v24  ;;  %v922_v60 = vpop.f32.mrb[25].mxu0  ;;  %v1301_v43 = vpop.eup %1300 }
 0x354   : > { %v980_v27 = vmul.f32 %v1291_v63, %v922_v60  ;;  %v924_v29 = vpop.f32.mrb[26].mxu0  ;;  %v1303_v30 = vpop.eup %1302 }
 0x355   : > { %1314 = vtanh.f32 %v979_v26  ;;  %v981_v44 = vmul.f32 %v1301_v43, %v924_v29  ;;  %v926_v37 = vpop.f32.mrb[27].mxu0 }
 0x356   : > { %1316 = vtanh.f32 %v980_v27  ;;  %v982_v31 = vmul.f32 %v1301_v43, %v926_v37 }
 0x357   : > { %v1305_v18 = vpop.eup %1304  ;;  %1318 = vtanh.f32 %v981_v44 }
 0x358   : > { %v1307_v4 = vpop.eup %1306  ;;  %1039 = vst [vmem:[%s1871_s30 + $0xa0] sm:$0xff] %v1305_v18  ;;  %1320 = vtanh.f32 %v982_v31 }
 0x359   : > { %v1309_v33 = vpop.eup %1308  ;;  %1040 = vst [vmem:[%s1871_s30 + $0xa8] sm:$0xff] %v1307_v4 }
 0x35a   : > { %v1311_v49 = vpop.eup %1310  ;;  %1041 = vst [vmem:[%s1871_s30 + $0xb0] sm:$0xff] %v1309_v33  ;;  %v930_v62 = vpop.f32.mrb[28].mxu0 }
 0x35b   : > { %1042 = vst [vmem:[%s1871_s30 + $0xb8] sm:$0xff] %v1311_v49  ;;  %v983_v35 = vmul.f32 %v1303_v30, %v930_v62  ;;  %v932_v51 = vpop.f32.mrb[29].mxu0  ;;  %v1313_v50 = vpop.eup %1312 }
 0x35c   : > { %v984_v61 = vmul.f32 %v1303_v30, %v932_v51  ;;  %v934_v36 = vpop.f32.mrb[30].mxu0 }
 0x35d   : > { %1322 = vtanh.f32 %v983_v35  ;;  %v985_v5 = vmul.f32 %v1313_v50, %v934_v36  ;;  %v936_v1 = vpop.f32.mrb[31].mxu0 }
 0x35e   : > { %1324 = vtanh.f32 %v984_v61  ;;  %v986_v38 = vmul.f32 %v1313_v50, %v936_v1 }
 0x35f   : > { %v1315_v39 = vpop.eup %1314  ;;  %1326 = vtanh.f32 %v985_v5 }
 0x360   : > { %v1317_v55 = vpop.eup %1316  ;;  %1043 = vst [vmem:[%s1871_s30 + $0xc0] sm:$0xff] %v1315_v39  ;;  %1328 = vtanh.f32 %v986_v38 }
 0x361   : > { %v1319_v57 = vpop.eup %1318  ;;  %1044 = vst [vmem:[%s1871_s30 + $0xc8] sm:$0xff] %v1317_v55 }
 0x362   : > { %v1321_v58 = vpop.eup %1320  ;;  %1045 = vst [vmem:[%s1871_s30 + $0xd0] sm:$0xff] %v1319_v57 }
 0x363   : > { %1046 = vst [vmem:[%s1871_s30 + $0xd8] sm:$0xff] %v1321_v58 }
 0x367   : > { %v1323_v6 = vpop.eup %1322 }
 0x368   : > { %v1325_v53 = vpop.eup %1324  ;;  %1047 = vst [vmem:[%s1871_s30 + $0xe0] sm:$0xff] %v1323_v6 }
 0x369   : > { %v1327_v54 = vpop.eup %1326  ;;  %1048 = vst [vmem:[%s1871_s30 + $0xe8] sm:$0xff] %v1325_v53 }
 0x36a   : > { %v1329_v28 = vpop.eup %1328  ;;  %1049 = vst [vmem:[%s1871_s30 + $0xf0] sm:$0xff] %v1327_v54 }
 0x36b   : > { %1050 = vst [vmem:[%s1871_s30 + $0xf8] sm:$0xff] %v1329_v28 }
 0x36c   : > { %1371 = shalt.err (!%p1368_p4)
}
 0x36d   : > { %s1372_s12 = scalar_lea.hbm %s1907_s7, 4096  ;;  %s1376_s20 = scalar_lea.hbm %s1961_s4, 8192 }
 0x36e   : > { %p1373_p7 = scmp.ne.s32.totalorder %s1907_s7, %s1372_s12  ;;  %p1377_p13 = scmp.lt.u32.totalorder %s1907_s7, %s1961_s4 }
 0x36f   : > { %p1378_p1 = scmp.lt.u32.totalorder %s1376_s20, %s1372_s12  ;;  %p1380_p5 = scmp.lt.u32.totalorder %s1372_s12, %s1907_s7 }
 0x370   : > { %p1374_p8 = pnand %p1373_p7, %p1972_p6 }
 0x371   : > { %p1379_p0 = por %p1378_p1, %p1377_p13 }
 0x372   : > { %p1375_p11 = pneg %p1374_p8 }
 0x373   : > { %p1381_p9 = por %p1380_p5, %p1379_p0 }
 0x375   : > { %p1382_p10 = pnand %p1381_p9, %p1375_p11 }
 0x377   : > { %1385 = shalt.err (!%p1382_p10)
}
 0x378   : > { %s1431_s28 = smov 256   ;;  %s1432_s30 = smov 16  }
 0x379   : > { %1151 = dma.vmem_to_hbm [thread:$0]  (%p1972_p6), %s1909_s27, 4096, %s1907_s7, %s1916_s19, %s1431_s28, %s1431_s28, %s1432_s30  }
 0x37a PF: > { %p1163_p12 = scmp.ge.s32.totalorder %s1424_s18, 2  ;;  %s1080_s29 = sand.u32 1, %s1412_s15  }
 0x37b   : > { %p1973_p2 = scmp.ne.s32.totalorder %s1966_s26, 0  ;;  %s1081_s5 = scalar_lea.sflag [#allocation4], %s1080_s29 }
 0x37d   : > { %p1158_p3 = pnand %p1163_p12, %p1973_p2 }
 0x37f   : > { %1407 = dma.done.wait (!%p1158_p3), %s1081_s5, 4096  }
 0x380   : > { %1409 = vsyncadd (!%p1158_p3), %s1081_s5, 4294963200  ;;  %p15_p4 = scmp.ge.s32.totalorder %s1483_s21, 4   ;;  %s1974_s15 = smov %s1416_s16 }
 0x381   : > { %s1975_s16 = smov %s1420_s17  ;;  %s1976_s17 = smov %s1494_s24 }
 0x382   : > { %s1977_s18 = smov %s1483_s21  ;;  %17 = sbr.rel (!%p15_p4) target bundleno = 4 (0x4), region = 73 }
 0x389   :  { %1086 = vsyncpa [#allocation3], 1 }
 0x38a   :  { %1088 = vsyncpa [#allocation3 + $0x1], 1 }
 0x38b   :  { %1089 = vsyncpa [#allocation4], 1 }
 0x38c   :  { %1091 = vsyncpa [#allocation4 + $0x1], 1 }

</bundles_post_ra>
